<compile_context>
chip_gen: v5e
topology: v5e:2x2
jax: 0.10.0
libtpu: 0.0.40
codegen_flags: <defaults>
</compile_context>

<pallas_src>
import jax
import jax.numpy as jnp
from jax import lax
from jax.experimental import pallas as pl
from jax.experimental.pallas import tpu as pltpu


def _round_up(x, m):
    return ((x + m - 1) // m) * m


def _cdiv(a, b):
    return -(-a // b)


_SUBLANE_BY_ITEMSIZE = {1: 32, 2: 16, 4: 8, 8: 8}


def _sublane(dtype):
    return _SUBLANE_BY_ITEMSIZE.get(jnp.dtype(dtype).itemsize, 8)


def _row_vmem_bytes(arr):
    return _round_up(arr.shape[1], 128) * jnp.dtype(arr.dtype).itemsize


def _lane_regroup(x2d, max_width=1024):
    """Largest free (contiguous-reshape) row-group factor g: (R, C) -> (R/g, g*C)
    maximizing 128-lane utilization.  Sum-reductions are order independent, so
    this is purely a layout change."""
    rows, cols = x2d.shape
    if cols >= 128 or rows <= 1:
        return 1
    best_g, best_key = 1, (cols / _round_up(cols, 128), cols)
    g_max = min(rows, max(1, max_width // cols))
    for g in range(2, g_max + 1):
        if rows % g:
            continue
        w = g * cols
        key = (w / _round_up(w, 128), w)
        if key > best_key:
            best_key, best_g = key, g
    return best_g


def _device_limits():
    """Derive (vmem_limit_bytes, double-buffered-input budget, num TensorCores)."""
    phys = None
    kind = ""
    try:
        kind = jax.devices()[0].device_kind.lower()
    except Exception:
        pass
    try:
        info = pltpu.get_tpu_info()
        for attr in ("vmem_capacity_bytes", "vmem_bytes", "vmem_size_bytes"):
            v = getattr(info, attr, None)
            if v:
                phys = int(v)
                break
    except Exception:
        pass
    is_v7 = ("v7" in kind) or ("tpu7" in kind)
    if phys is None:
        if is_v7:
            phys = 64 * 1024 * 1024           # v7x: 64 MiB per TensorCore
        elif ("v2" in kind) or ("v3" in kind):
            phys = 16 * 1024 * 1024
        else:
            phys = 128 * 1024 * 1024          # v4 / v5e / v5p / v6e
    num_cores = 2 if is_v7 else 1
    vmem_limit = min(phys * 3 // 4, 96 * 1024 * 1024)
    if phys >= 64 * 1024 * 1024:
        vmem_limit = max(vmem_limit, 32 * 1024 * 1024)
    input_budget = vmem_limit // 2
    return vmem_limit, input_budget, num_cores


def _make_kernel(*, margin, rank_scale, rank_rows, rank_tile, reg_meta):
    """reg_meta: tuple of (tile_rows, valid_rows, scale) per regularization input."""
    n_reg = len(reg_meta)

    def kernel(*refs):
        pos_ref, neg_ref = refs[0], refs[1]
        reg_refs = refs[2:2 + n_reg]
        out_ref = refs[2 + n_reg]
        acc_ref = refs[3 + n_reg]           # SMEM f32[2]: [ranking, reg]

        c = pl.program_id(0)
        j = pl.program_id(1)
        k_steps = pl.num_programs(1)
        step = c * k_steps + j              # global (unclamped) step index

        @pl.when(j == 0)
        def _init():
            acc_ref[0] = jnp.float32(0.0)
            acc_ref[1] = jnp.float32(0.0)

        # ----- ranking term: softplus(neg - pos + margin), tail rows masked -----
        pos = pos_ref[...].astype(jnp.float32)
        neg = neg_ref[...].astype(jnp.float32)
        x = neg - pos + margin              # broadcasts (t,1) against (t,N) if needed
        sp = jnp.maximum(x, 0.0) + jnp.log(1.0 + jnp.exp(-jnp.abs(x)))
        row = step * rank_tile + lax.broadcasted_iota(jnp.int32, sp.shape, 0)
        sp = jnp.where(row < rank_rows, sp, 0.0)
        rank_partial = rank_scale * jnp.sum(sp)

        # ----- L2 regularization terms (means / coefficients pre-folded) --------
        reg_partial = jnp.float32(0.0)
        for ref, (tile, rows, scale) in zip(reg_refs, reg_meta):
            v = ref[...].astype(jnp.float32)
            r = step * tile + lax.broadcasted_iota(jnp.int32, v.shape, 0)
            sq = jnp.where(r < rows, v * v, 0.0)
            reg_partial = reg_partial + scale * jnp.sum(sq)

        acc_ref[0] = acc_ref[0] + rank_partial
        acc_ref[1] = acc_ref[1] + reg_partial

        # ----- single lane-dense output write on the final step -----------------
        @pl.when(j == k_steps - 1)
        def _finalize():
            lane = lax.broadcasted_iota(jnp.int32, out_ref.shape, out_ref.ndim - 1)
            out_ref[...] = jnp.where(lane == 0, acc_ref[0],
                                     jnp.where(lane == 1, acc_ref[1],
                                               jnp.float32(0.0)))

    return kernel


def enhanced_bpr_loss(pos_scores, neg_scores, user_embeddings=None,
                      item_pos_embeddings=None, item_neg_embeddings=None, *,
                      margin=1.0, user_reg=0.0, item_reg=0.0, reduction="mean",
                      max_block_bytes=None):
    """Returns {'loss', 'ranking_loss', 'reg_loss'} scalars (mirrors the torch module)."""
    if reduction == "none":
        # TODO(synk): reduction='none' yields a per-element ranking tensor; this
        # scalar-reduction kernel only implements 'mean' / 'sum'.
        raise NotImplementedError("reduction='none' is not supported by the Pallas kernel")
    if reduction not in ("mean", "sum"):
        raise ValueError(f"Unsupported reduction: {reduction}")

    # ---- canonicalize score shapes (mirrors the torch broadcast rules) --------
    if not jnp.issubdtype(pos_scores.dtype, jnp.floating):
        pos_scores = pos_scores.astype(jnp.float32)
    if not jnp.issubdtype(neg_scores.dtype, jnp.floating):
        neg_scores = neg_scores.astype(jnp.float32)
    if neg_scores.ndim > pos_scores.ndim:
        pos2d, neg2d = pos_scores.reshape(pos_scores.shape[0], 1), neg_scores
    elif neg_scores.ndim == 1:
        pos2d, neg2d = pos_scores.reshape(-1, 1), neg_scores.reshape(-1, 1)
    else:
        pos2d, neg2d = pos_scores, neg_scores
    B, N = neg2d.shape
    P = pos2d.shape[1]
    if pos2d.shape[0] != B or P not in (1, N):
        raise ValueError("pos_scores / neg_scores shapes are not broadcast-compatible")
    n_rank = B * N
    rank_scale = (1.0 / n_rank) if reduction == "mean" else 1.0

    # ---- lane-densify the score stream ----------------------------------------
    # Tiny-N broadcast case: materialize pos at neg's shape (small, review-OK)
    # so both streams regroup identically to wide lane-dense rows for free.
    if P == 1 and 1 < N < 128:
        pos2d = jnp.broadcast_to(pos2d, (B, N))
        P = N
    if pos2d.shape == neg2d.shape:
        g = _lane_regroup(neg2d)
        if g > 1:
            neg2d = neg2d.reshape(B // g, g * neg2d.shape[1])
            pos2d = pos2d.reshape(neg2d.shape)
    rank_rows = neg2d.shape[0]

    # ---- regularization streams (dropped entirely when coefficient is 0) ------
    reg_arrays, reg_scales = [], []

    def _add_reg(emb, coeff, norm_rows):
        arr = emb if emb.ndim == 2 else emb.reshape(emb.shape[0], -1)
        g = _lane_regroup(arr)
        if g > 1:
            arr = arr.reshape(arr.shape[0] // g, arr.shape[1] * g)
        reg_arrays.append(arr)
        reg_scales.append(float(coeff) / float(norm_rows))

    if user_reg > 0.0 and user_embeddings is not None:
        _add_reg(user_embeddings, user_reg, user_embeddings.shape[0])
    if item_reg > 0.0 and item_pos_embeddings is not None:
        _add_reg(item_pos_embeddings, item_reg, item_pos_embeddings.shape[0])
    if item_reg > 0.0 and item_neg_embeddings is not None:
        if item_neg_embeddings.ndim > 2:            # (B, n_neg, D): norm over dim=2
            rows = item_neg_embeddings.shape[0] * item_neg_embeddings.shape[1]
        else:                                        # (B, D): norm over dim=1
            rows = item_neg_embeddings.shape[0]
        _add_reg(item_neg_embeddings, item_reg, rows)

    # ---- tile sizing from a device-derived VMEM budget -------------------------
    vmem_limit, input_budget, num_cores = _device_limits()
    if max_block_bytes is not None:
        input_budget = int(max_block_bytes)

    rank_sub = max(_sublane(pos2d.dtype), _sublane(neg2d.dtype))
    groups = [dict(arrays=[pos2d, neg2d], rows=rank_rows, sub=rank_sub)]
    for arr in reg_arrays:
        groups.append(dict(arrays=[arr], rows=arr.shape[0], sub=_sublane(arr.dtype)))

    def _tile(grp, n_steps):
        t = _round_up(_cdiv(grp["rows"], n_steps), grp["sub"])
        return grp["rows"] if t >= grp["rows"] else t   # full dim => always legal

    def _step_bytes(n_steps):                            # double-buffered inputs
        return sum(2 * _tile(g, n_steps) * sum(_row_vmem_bytes(a) for a in g["arrays"])
                   for g in groups)

    max_steps = max(_cdiv(g["rows"], g["sub"]) for g in groups)
    n_steps = max(1, min(max_steps, _cdiv(_step_bytes(1), input_budget)))
    for _ in range(64):
        if n_steps >= max_steps or _step_bytes(n_steps) <= input_budget:
            break
        n_steps += 1

    splits = num_cores if (num_cores > 1 and n_steps >= 2) else 1
    k_steps = _cdiv(n_steps, splits)

    # ---- BlockSpecs: per-stream tiles, clamped index maps, no host padding -----
    def _spec(arr, tile):
        n_blocks = _cdiv(arr.shape[0], tile)

        def idx(c, j, _nb=n_blocks):
            return (jnp.minimum(c * k_steps + j, _nb - 1), 0)

        return pl.BlockSpec((tile, arr.shape[1]), idx)

    rank_tile = _tile(groups[0], n_steps)
    in_specs = [_spec(pos2d, rank_tile), _spec(neg2d, rank_tile)]
    args = [pos2d, neg2d]
    reg_meta = []
    for grp, arr, scale in zip(groups[1:], reg_arrays, reg_scales):
        tile = _tile(grp, n_steps)
        in_specs.append(_spec(arr, tile))
        args.append(arr)
        reg_meta.append((tile, arr.shape[0], scale))

    kernel = _make_kernel(margin=float(margin), rank_scale=float(rank_scale),
                          rank_rows=rank_rows, rank_tile=rank_tile,
                          reg_meta=tuple(reg_meta))

    out = pl.pallas_call(
        kernel,
        grid=(splits, k_steps),
        in_specs=in_specs,
        out_specs=pl.BlockSpec((1, 8, 128), lambda c, j: (c, 0, 0)),
        out_shape=jax.ShapeDtypeStruct((splits, 8, 128), jnp.float32),
        scratch_shapes=[pltpu.SMEM((2,), jnp.float32)],
        compiler_params=pltpu.CompilerParams(
            dimension_semantics=("parallel", "arbitrary"),
            vmem_limit_bytes=vmem_limit),
    )(*args)

    ranking_loss = jnp.sum(out[:, 0, 0])       # combine per-core partials
    reg_loss = jnp.sum(out[:, 0, 1])
    return {"loss": ranking_loss + reg_loss,
            "ranking_loss": ranking_loss,
            "reg_loss": reg_loss}


def _reference(pos_scores, neg_scores, user_emb, item_pos_emb, item_neg_emb,
               margin, user_reg, item_reg, reduction="mean"):
    pos = pos_scores[:, None] if neg_scores.ndim > pos_scores.ndim else pos_scores
    sp = jnp.logaddexp(0.0, -(pos - neg_scores - margin))
    ranking = jnp.mean(sp) if reduction == "mean" else jnp.sum(sp)
    reg = jnp.float32(0.0)
    if user_reg > 0.0 and user_emb is not None:
        reg = reg + user_reg * jnp.mean(jnp.sum(user_emb.astype(jnp.float32) ** 2, axis=1))
    if item_reg > 0.0 and item_pos_emb is not None:
        reg = reg + item_reg * jnp.mean(jnp.sum(item_pos_emb.astype(jnp.float32) ** 2, axis=1))
    if item_reg > 0.0 and item_neg_emb is not None:
        ax = 2 if item_neg_emb.ndim > 2 else 1
        reg = reg + item_reg * jnp.mean(jnp.sum(item_neg_emb.astype(jnp.float32) ** 2, axis=ax))
    return ranking + reg, ranking, reg


if __name__ == "__main__":
    key = jax.random.PRNGKey(0)
    k1, k2, k3, k4, k5 = jax.random.split(key, 5)

    B, N, D = 8, 4, 16
    margin, user_reg, item_reg = 1.0, 0.01, 0.01

    pos_scores = jax.random.normal(k1, (B,), dtype=jnp.float32)
    neg_scores = jax.random.normal(k2, (B, N), dtype=jnp.float32)
    user_emb = jax.random.normal(k3, (B, D), dtype=jnp.float32)
    item_pos_emb = jax.random.normal(k4, (B, D), dtype=jnp.float32)
    item_neg_emb = jax.random.normal(k5, (B, N, D), dtype=jnp.float32)

    # 1) full configuration, mean reduction (single-step grid, regrouped lanes)
    out = enhanced_bpr_loss(pos_scores, neg_scores, user_emb, item_pos_emb,
                            item_neg_emb, margin=margin, user_reg=user_reg,
                            item_reg=item_reg, reduction="mean")
    jax.block_until_ready(out["loss"])
    ref_total, ref_rank, ref_reg = _reference(pos_scores, neg_scores, user_emb,
                                              item_pos_emb, item_neg_emb,
                                              margin, user_reg, item_reg, "mean")
    assert jnp.allclose(out["loss"], ref_total, rtol=1e-4, atol=1e-5)
    assert jnp.allclose(out["ranking_loss"], ref_rank, rtol=1e-4, atol=1e-5)
    assert jnp.allclose(out["reg_loss"], ref_reg, rtol=1e-4, atol=1e-5)

    # 2) no regularization inputs -> their DMA is skipped entirely; 'sum' path
    out2 = enhanced_bpr_loss(pos_scores, neg_scores, margin=margin, reduction="sum")
    jax.block_until_ready(out2["loss"])
    ref2_total, ref2_rank, _ = _reference(pos_scores, neg_scores, None, None, None,
                                          margin, 0.0, 0.0, "sum")
    assert jnp.allclose(out2["loss"], ref2_total, rtol=1e-4, atol=1e-5)
    assert jnp.allclose(out2["ranking_loss"], ref2_rank, rtol=1e-4, atol=1e-5)
    assert jnp.allclose(out2["reg_loss"], 0.0)

    # 3) multi-step grid (small forced budget): exercises accumulation across
    #    steps, clamped index maps for early-finishing streams and tail masks.
    B2 = 300
    j1, j2, j3, j4, j5 = jax.random.split(jax.random.PRNGKey(1), 5)
    pos2 = jax.random.normal(j1, (B2,), dtype=jnp.float32)
    neg2 = jax.random.normal(j2, (B2, N), dtype=jnp.float32)
    ue2 = jax.random.normal(j3, (B2, D), dtype=jnp.float32)
    ip2 = jax.random.normal(j4, (B2, D), dtype=jnp.float32)
    in2 = jax.random.normal(j5, (B2, N, D), dtype=jnp.float32)
    out3 = enhanced_bpr_loss(pos2, neg2, ue2, ip2, in2, margin=margin,
                             user_reg=user_reg, item_reg=item_reg,
                             reduction="mean", max_block_bytes=64 * 1024)
    jax.block_until_ready(out3["loss"])
    ref3_total, ref3_rank, ref3_reg = _reference(pos2, neg2, ue2, ip2, in2,
                                                 margin, user_reg, item_reg, "mean")
    assert jnp.allclose(out3["loss"], ref3_total, rtol=1e-4, atol=1e-5)
    assert jnp.allclose(out3["ranking_loss"], ref3_rank, rtol=1e-4, atol=1e-5)
    assert jnp.allclose(out3["reg_loss"], ref3_reg, rtol=1e-4, atol=1e-5)

    # 4) wide-N path (N >= 128): pos stays a (B, 1) column, broadcast in-kernel
    l1, l2 = jax.random.split(jax.random.PRNGKey(2), 2)
    pos4 = jax.random.normal(l1, (64,), dtype=jnp.float32)
    neg4 = jax.random.normal(l2, (64, 256), dtype=jnp.float32)
    out4 = enhanced_bpr_loss(pos4, neg4, margin=margin, reduction="mean")
    jax.block_until_ready(out4["loss"])
    ref4_total, ref4_rank, _ = _reference(pos4, neg4, None, None, None,
                                          margin, 0.0, 0.0, "mean")
    assert jnp.allclose(out4["loss"], ref4_total, rtol=1e-4, atol=1e-5)
    assert jnp.allclose(out4["ranking_loss"], ref4_rank, rtol=1e-4, atol=1e-5)

    print("KERNEL_OK")
</pallas_src>

<mosaic_0001>
module attributes {stable_mosaic.version = 11 : i64} {
  func.func @kernel(%arg0: i32, %arg1: i32, %arg2: memref<1x32xf32, #tpu.memory_space<vmem>>, %arg3: memref<1x32xf32, #tpu.memory_space<vmem>>, %arg4: memref<1x128xf32, #tpu.memory_space<vmem>>, %arg5: memref<1x128xf32, #tpu.memory_space<vmem>>, %arg6: memref<1x512xf32, #tpu.memory_space<vmem>>, %arg7: memref<1x8x128xf32, #tpu.memory_space<vmem>>, %arg8: memref<2xf32, #tpu.memory_space<smem>>) attributes {dimension_semantics = [#tpu.dimension_semantics<parallel>, #tpu.dimension_semantics<arbitrary>], iteration_bounds = array<i64: 1, 1>, scalar_prefetch = 0 : i64, scratch_operands = 1 : i64, tpu.core_type = #tpu.core_type<tc>, window_params = [{transform_indices = @transform_0, window_bounds = array<i64: 1, 32>}, {transform_indices = @transform_1, window_bounds = array<i64: 1, 32>}, {transform_indices = @transform_2, window_bounds = array<i64: 1, 128>}, {transform_indices = @transform_3, window_bounds = array<i64: 1, 128>}, {transform_indices = @transform_4, window_bounds = array<i64: 1, 512>}, {transform_indices = @transform_5, window_bounds = array<i64: 1, 8, 128>}]} {
    %c1_i32 = arith.constant 1 : i32
    %0 = arith.muli %arg0, %c1_i32 : i32
    %1 = arith.addi %0, %arg1 : i32
    %c0_i32 = arith.constant 0 : i32
    %2 = arith.cmpi eq, %arg1, %c0_i32 : i32
    %3 = arith.extui %2 : i1 to i32
    %c0_i32_0 = arith.constant 0 : i32
    %4 = arith.cmpi ne, %3, %c0_i32_0 : i32
    scf.if %4 {
      %cst_39 = arith.constant 0.000000e+00 : f32
      %c0_40 = arith.constant 0 : index
      %90 = memref.load %arg8[%c0_40] : memref<2xf32, #tpu.memory_space<smem>>
      memref.store %cst_39, %arg8[%c0_40] : memref<2xf32, #tpu.memory_space<smem>>
      %cst_41 = arith.constant 0.000000e+00 : f32
      %c1_42 = arith.constant 1 : index
      %91 = memref.load %arg8[%c1_42] : memref<2xf32, #tpu.memory_space<smem>>
      memref.store %cst_41, %arg8[%c1_42] : memref<2xf32, #tpu.memory_space<smem>>
    } else {
    }
    %c0 = arith.constant 0 : index
    %c0_1 = arith.constant 0 : index
    %5 = vector.load %arg2[%c0, %c0_1] : memref<1x32xf32, #tpu.memory_space<vmem>>, vector<1x32xf32>
    %c0_2 = arith.constant 0 : index
    %c0_3 = arith.constant 0 : index
    %6 = vector.load %arg3[%c0_2, %c0_3] : memref<1x32xf32, #tpu.memory_space<vmem>>, vector<1x32xf32>
    %7 = arith.subf %6, %5 : vector<1x32xf32>
    %cst = arith.constant 1.000000e+00 : f32
    %8 = vector.broadcast %cst : f32 to vector<1x32xf32>
    %9 = arith.addf %7, %8 : vector<1x32xf32>
    %cst_4 = arith.constant 0.000000e+00 : f32
    %10 = vector.broadcast %cst_4 : f32 to vector<1x32xf32>
    %11 = arith.maximumf %9, %10 : vector<1x32xf32>
    %12 = math.absf %9 : vector<1x32xf32>
    %cst_5 = arith.constant 0.000000e+00 : f32
    %13 = vector.broadcast %cst_5 : f32 to vector<1x32xf32>
    %14 = arith.subf %13, %12 : vector<1x32xf32>
    %15 = math.exp %14 : vector<1x32xf32>
    %cst_6 = arith.constant 1.000000e+00 : f32
    %16 = vector.broadcast %cst_6 : f32 to vector<1x32xf32>
    %17 = arith.addf %16, %15 : vector<1x32xf32>
    %18 = math.log %17 : vector<1x32xf32>
    %19 = arith.addf %11, %18 : vector<1x32xf32>
    %c1_i32_7 = arith.constant 1 : i32
    %20 = arith.muli %1, %c1_i32_7 : i32
    %21 = tpu.iota {dimensions = array<i32: 0>} : vector<1x32xi32>
    %22 = vector.broadcast %20 : i32 to vector<1x32xi32>
    %23 = arith.addi %22, %21 : vector<1x32xi32>
    %c1_i32_8 = arith.constant 1 : i32
    %24 = vector.broadcast %c1_i32_8 : i32 to vector<1x32xi32>
    %25 = arith.cmpi slt, %23, %24 : vector<1x32xi32>
    %cst_9 = arith.constant 0.000000e+00 : f32
    %26 = vector.broadcast %cst_9 : f32 to vector<1x32xf32>
    %27 = arith.select %25, %19, %26 : vector<1x32xi1>, vector<1x32xf32>
    %28 = vector.shape_cast %27 : vector<1x32xf32> to vector<1x1x32xf32>
    %cst_10 = arith.constant dense<0.000000e+00> : vector<1xf32>
    %29 = vector.multi_reduction <add>, %28, %cst_10 [1, 2] : vector<1x1x32xf32> to vector<1xf32>
    %30 = vector.shape_cast %29 : vector<1xf32> to vector<1x1x1xf32>
    %31 = vector.extract %30[0, 0, 0] : f32 from vector<1x1x1xf32>
    %cst_11 = arith.constant 3.125000e-02 : f32
    %32 = arith.mulf %cst_11, %31 : f32
    %c0_12 = arith.constant 0 : index
    %c0_13 = arith.constant 0 : index
    %33 = vector.load %arg4[%c0_12, %c0_13] : memref<1x128xf32, #tpu.memory_space<vmem>>, vector<1x128xf32>
    %c1_i32_14 = arith.constant 1 : i32
    %34 = arith.muli %1, %c1_i32_14 : i32
    %35 = tpu.iota {dimensions = array<i32: 0>} : vector<1x128xi32>
    %36 = vector.broadcast %34 : i32 to vector<1x128xi32>
    %37 = arith.addi %36, %35 : vector<1x128xi32>
    %c1_i32_15 = arith.constant 1 : i32
    %38 = vector.broadcast %c1_i32_15 : i32 to vector<1x128xi32>
    %39 = arith.cmpi slt, %37, %38 : vector<1x128xi32>
    %40 = arith.mulf %33, %33 : vector<1x128xf32>
    %cst_16 = arith.constant 0.000000e+00 : f32
    %41 = vector.broadcast %cst_16 : f32 to vector<1x128xf32>
    %42 = arith.select %39, %40, %41 : vector<1x128xi1>, vector<1x128xf32>
    %43 = vector.shape_cast %42 : vector<1x128xf32> to vector<1x1x128xf32>
    %cst_17 = arith.constant dense<0.000000e+00> : vector<1xf32>
    %44 = vector.multi_reduction <add>, %43, %cst_17 [1, 2] : vector<1x1x128xf32> to vector<1xf32>
    %45 = vector.shape_cast %44 : vector<1xf32> to vector<1x1x1xf32>
    %46 = vector.extract %45[0, 0, 0] : f32 from vector<1x1x1xf32>
    %cst_18 = arith.constant 1.250000e-03 : f32
    %47 = arith.mulf %cst_18, %46 : f32
    %cst_19 = arith.constant 0.000000e+00 : f32
    %48 = arith.addf %cst_19, %47 : f32
    %c0_20 = arith.constant 0 : index
    %c0_21 = arith.constant 0 : index
    %49 = vector.load %arg5[%c0_20, %c0_21] : memref<1x128xf32, #tpu.memory_space<vmem>>, vector<1x128xf32>
    %c1_i32_22 = arith.constant 1 : i32
    %50 = arith.muli %1, %c1_i32_22 : i32
    %51 = tpu.iota {dimensions = array<i32: 0>} : vector<1x128xi32>
    %52 = vector.broadcast %50 : i32 to vector<1x128xi32>
    %53 = arith.addi %52, %51 : vector<1x128xi32>
    %c1_i32_23 = arith.constant 1 : i32
    %54 = vector.broadcast %c1_i32_23 : i32 to vector<1x128xi32>
    %55 = arith.cmpi slt, %53, %54 : vector<1x128xi32>
    %56 = arith.mulf %49, %49 : vector<1x128xf32>
    %cst_24 = arith.constant 0.000000e+00 : f32
    %57 = vector.broadcast %cst_24 : f32 to vector<1x128xf32>
    %58 = arith.select %55, %56, %57 : vector<1x128xi1>, vector<1x128xf32>
    %59 = vector.shape_cast %58 : vector<1x128xf32> to vector<1x1x128xf32>
    %cst_25 = arith.constant dense<0.000000e+00> : vector<1xf32>
    %60 = vector.multi_reduction <add>, %59, %cst_25 [1, 2] : vector<1x1x128xf32> to vector<1xf32>
    %61 = vector.shape_cast %60 : vector<1xf32> to vector<1x1x1xf32>
    %62 = vector.extract %61[0, 0, 0] : f32 from vector<1x1x1xf32>
    %cst_26 = arith.constant 1.250000e-03 : f32
    %63 = arith.mulf %cst_26, %62 : f32
    %64 = arith.addf %48, %63 : f32
    %c0_27 = arith.constant 0 : index
    %c0_28 = arith.constant 0 : index
    %65 = vector.load %arg6[%c0_27, %c0_28] : memref<1x512xf32, #tpu.memory_space<vmem>>, vector<1x512xf32>
    %c1_i32_29 = arith.constant 1 : i32
    %66 = arith.muli %1, %c1_i32_29 : i32
    %67 = tpu.iota {dimensions = array<i32: 0>} : vector<1x512xi32>
    %68 = vector.broadcast %66 : i32 to vector<1x512xi32>
    %69 = arith.addi %68, %67 : vector<1x512xi32>
    %c1_i32_30 = arith.constant 1 : i32
    %70 = vector.broadcast %c1_i32_30 : i32 to vector<1x512xi32>
    %71 = arith.cmpi slt, %69, %70 : vector<1x512xi32>
    %72 = arith.mulf %65, %65 : vector<1x512xf32>
    %cst_31 = arith.constant 0.000000e+00 : f32
    %73 = vector.broadcast %cst_31 : f32 to vector<1x512xf32>
    %74 = arith.select %71, %72, %73 : vector<1x512xi1>, vector<1x512xf32>
    %75 = vector.shape_cast %74 : vector<1x512xf32> to vector<1x1x512xf32>
    %cst_32 = arith.constant dense<0.000000e+00> : vector<1xf32>
    %76 = vector.multi_reduction <add>, %75, %cst_32 [1, 2] : vector<1x1x512xf32> to vector<1xf32>
    %77 = vector.shape_cast %76 : vector<1xf32> to vector<1x1x1xf32>
    %78 = vector.extract %77[0, 0, 0] : f32 from vector<1x1x1xf32>
    %cst_33 = arith.constant 3.125000e-04 : f32
    %79 = arith.mulf %cst_33, %78 : f32
    %80 = arith.addf %64, %79 : f32
    %c0_34 = arith.constant 0 : index
    %81 = memref.load %arg8[%c0_34] : memref<2xf32, #tpu.memory_space<smem>>
    %82 = arith.addf %81, %32 : f32
    %c0_35 = arith.constant 0 : index
    %83 = memref.load %arg8[%c0_35] : memref<2xf32, #tpu.memory_space<smem>>
    memref.store %82, %arg8[%c0_35] : memref<2xf32, #tpu.memory_space<smem>>
    %c1 = arith.constant 1 : index
    %84 = memref.load %arg8[%c1] : memref<2xf32, #tpu.memory_space<smem>>
    %85 = arith.addf %84, %80 : f32
    %c1_36 = arith.constant 1 : index
    %86 = memref.load %arg8[%c1_36] : memref<2xf32, #tpu.memory_space<smem>>
    memref.store %85, %arg8[%c1_36] : memref<2xf32, #tpu.memory_space<smem>>
    %c0_i32_37 = arith.constant 0 : i32
    %87 = arith.cmpi eq, %arg1, %c0_i32_37 : i32
    %88 = arith.extui %87 : i1 to i32
    %c0_i32_38 = arith.constant 0 : i32
    %89 = arith.cmpi ne, %88, %c0_i32_38 : i32
    scf.if %89 {
      %90 = tpu.iota {dimensions = array<i32: 2>} : vector<1x8x128xi32>
      %c0_i32_39 = arith.constant 0 : i32
      %91 = vector.broadcast %c0_i32_39 : i32 to vector<1x8x128xi32>
      %92 = arith.cmpi eq, %90, %91 : vector<1x8x128xi32>
      %c0_40 = arith.constant 0 : index
      %93 = memref.load %arg8[%c0_40] : memref<2xf32, #tpu.memory_space<smem>>
      %c1_i32_41 = arith.constant 1 : i32
      %94 = vector.broadcast %c1_i32_41 : i32 to vector<1x8x128xi32>
      %95 = arith.cmpi eq, %90, %94 : vector<1x8x128xi32>
      %c1_42 = arith.constant 1 : index
      %96 = memref.load %arg8[%c1_42] : memref<2xf32, #tpu.memory_space<smem>>
      %cst_43 = arith.constant 0.000000e+00 : f32
      %97 = vector.broadcast %96 : f32 to vector<1x8x128xf32>
      %98 = vector.broadcast %cst_43 : f32 to vector<1x8x128xf32>
      %99 = arith.select %95, %97, %98 : vector<1x8x128xi1>, vector<1x8x128xf32>
      %100 = vector.broadcast %93 : f32 to vector<1x8x128xf32>
      %101 = arith.select %92, %100, %99 : vector<1x8x128xi1>, vector<1x8x128xf32>
      %c0_44 = arith.constant 0 : index
      %c0_45 = arith.constant 0 : index
      %c0_46 = arith.constant 0 : index
      %102 = vector.load %arg7[%c0_44, %c0_45, %c0_46] : memref<1x8x128xf32, #tpu.memory_space<vmem>>, vector<1x8x128xf32>
      tpu.vector_store %arg7[%c0_44, %c0_45, %c0_46], %101 {strides = array<i32>} : memref<1x8x128xf32, #tpu.memory_space<vmem>>, vector<1x8x128xf32>,
    } else {
    }
    return
  }
  func.func @transform_0(%arg0: i32, %arg1: i32) -> (i32, i32) {
    %c1_i32 = arith.constant 1 : i32
    %0 = arith.muli %arg0, %c1_i32 : i32
    %1 = arith.addi %0, %arg1 : i32
    %c0_i32 = arith.constant 0 : i32
    %2 = arith.minsi %1, %c0_i32 : i32
    %c0_i32_0 = arith.constant 0 : i32
    %c0_i32_1 = arith.constant 0 : i32
    return %2, %c0_i32_0 : i32, i32
  }
  func.func @transform_1(%arg0: i32, %arg1: i32) -> (i32, i32) {
    %c1_i32 = arith.constant 1 : i32
    %0 = arith.muli %arg0, %c1_i32 : i32
    %1 = arith.addi %0, %arg1 : i32
    %c0_i32 = arith.constant 0 : i32
    %2 = arith.minsi %1, %c0_i32 : i32
    %c0_i32_0 = arith.constant 0 : i32
    %c0_i32_1 = arith.constant 0 : i32
    return %2, %c0_i32_0 : i32, i32
  }
  func.func @transform_2(%arg0: i32, %arg1: i32) -> (i32, i32) {
    %c1_i32 = arith.constant 1 : i32
    %0 = arith.muli %arg0, %c1_i32 : i32
    %1 = arith.addi %0, %arg1 : i32
    %c0_i32 = arith.constant 0 : i32
    %2 = arith.minsi %1, %c0_i32 : i32
    %c0_i32_0 = arith.constant 0 : i32
    %c0_i32_1 = arith.constant 0 : i32
    return %2, %c0_i32_0 : i32, i32
  }
  func.func @transform_3(%arg0: i32, %arg1: i32) -> (i32, i32) {
    %c1_i32 = arith.constant 1 : i32
    %0 = arith.muli %arg0, %c1_i32 : i32
    %1 = arith.addi %0, %arg1 : i32
    %c0_i32 = arith.constant 0 : i32
    %2 = arith.minsi %1, %c0_i32 : i32
    %c0_i32_0 = arith.constant 0 : i32
    %c0_i32_1 = arith.constant 0 : i32
    return %2, %c0_i32_0 : i32, i32
  }
  func.func @transform_4(%arg0: i32, %arg1: i32) -> (i32, i32) {
    %c1_i32 = arith.constant 1 : i32
    %0 = arith.muli %arg0, %c1_i32 : i32
    %1 = arith.addi %0, %arg1 : i32
    %c0_i32 = arith.constant 0 : i32
    %2 = arith.minsi %1, %c0_i32 : i32
    %c0_i32_0 = arith.constant 0 : i32
    %c0_i32_1 = arith.constant 0 : i32
    return %2, %c0_i32_0 : i32, i32
  }
  func.func @transform_5(%arg0: i32, %arg1: i32) -> (i32, i32, i32) {
    %c0_i32 = arith.constant 0 : i32
    %c0_i32_0 = arith.constant 0 : i32
    %c0_i32_1 = arith.constant 0 : i32
    return %arg0, %c0_i32, %c0_i32_0 : i32, i32, i32
  }
}

</mosaic_0001>

<bundles_post_ra>
// kernel: tpu_custom_call.1
= control target key start
LH: loop header
LB: loop body
LE: loop exit
PB: predicated region body
PF: predicated region fallthrough
CT: control target
= control target key end

     0   :  { %10 = vsyncpa [#allocation4], 0  ;;  %s473_s0 = inlined_call_operand.hbm [shape: f32[1,32], index: 0, kind: input, shape index: {}]   ;;  %s474_s1 = inlined_call_operand.hbm [shape: f32[1,32], index: 1, kind: input, shape index: {}]   ;;  %s475_s2 = inlined_call_operand.vmem [shape: f32[1,128], index: 2, kind: input, shape index: {}]   ;;  %s476_s3 = inlined_call_operand.vmem [shape: f32[1,128], index: 3, kind: input, shape index: {}]   ;;  %s477_s4 = inlined_call_operand.hbm [shape: f32[1,512], index: 4, kind: input, shape index: {}]   ;;  %s478_s5 = inlined_call_operand.hbm [shape: f32[1,8,128], index: 5, kind: output, shape index: {}]  }
   0x1   :  { %11 = vsyncpa [#allocation7], 0  ;;  %s37_s20 = sshll.u32 %s474_s1, 4  ;;  %s38_s20 = int_to_ptr.hbm [resolvable:$true] %s37_s20 }
   0x2   :  { %12 = vsyncpa [#allocation5], 0  ;;  %s406_s21 = smov [#allocation6]   ;;  %s22_s25 = sshll.u32 %s473_s0, 4  ;;  %s23_s25 = int_to_ptr.hbm [resolvable:$true] %s22_s25 }
   0x3   :  { %s39_s22 = sshll.u32 %s406_s21, 4  ;;  %s407_s26 = smov [#allocation3]   ;;  %s40_s22 = int_to_ptr.vmem [resolvable:$true] %s39_s22 }
   0x4   :  { %42 = dma.hbm_to_vmem [thread:$0]  %s38_s20, 16, %s40_s22, [#allocation7]  }
   0x5   :  { %s24_s27 = sshll.u32 %s407_s26, 4  ;;  %s75_s30 = sshll.u32 %s477_s4, 4  ;;  %s25_s27 = int_to_ptr.vmem [resolvable:$true] %s24_s27  ;;  %s76_s30 = int_to_ptr.hbm [resolvable:$true] %s75_s30 }
   0x6   :  { %27 = dma.hbm_to_vmem [thread:$0]  %s23_s25, 16, %s25_s27, [#allocation4]  }
   0x7   :  { %s408_s1 = smov [#allocation8]  }
   0x8   :  { %s77_s6 = sshll.u32 %s408_s1, 4  ;;  %s78_s6 = int_to_ptr.vmem [resolvable:$true] %s77_s6 }
   0x9   :  { %80 = dma.hbm_to_vmem [thread:$0]  %s76_s30, 64, %s78_s6, [#allocation7]  }
   0xa   :  { %400 = dma.done.wait [#allocation4], 16  }
   0xb   :  { %401 = vsyncadd [#allocation4], 4294967280 }
   0xc   :  { %402 = dma.done.wait [#allocation7], 80  }
   0xd   :  { %403 = vsyncadd [#allocation7], 4294967216  ;;  %v154_v0 = vlaneseq  ;;  %v188_v2 = vld [vmem:[%s476_s3] sm:$0x1]  ;;  %v142_v4 = vld [vmem:[#allocation6] sm:$0x1] }
   0xe   :  { %v141_v3 = vld [vmem:[#allocation3] sm:$0x1]  ;;  %vm175_vm1 = vcmask 1040384   ;;  %v189_v5 = vmul.f32 %v188_v2, %v188_v2  ;;  %v203_v7 = vld [vmem:[#allocation8] sm:$0xf]  ;;  %vm160_vm2 = vcmask 253952  }
   0xf   :  { %v155_v1 = vshrl.u32 %v154_v0, 7  ;;  %v143_v6 = vsub.f32 %v142_v4, %v141_v3  ;;  %v204_v8 = vmul.f32 %v203_v7, %v203_v7  ;;  %v172_v35 = vld [vmem:[%s475_s2] sm:$0x1]  ;;  %v248_v7 = vand.u32 127, %v154_v0  ;;  %s409_s16 = smov [#allocation9]   ;;  %s265_s21 = sshll.u32 %s478_s5, 4  ;;  %s266_s21 = int_to_ptr.hbm [resolvable:$true] %s265_s21 }
  0x10   :  { %v173_v38 = vmul.f32 %v172_v35, %v172_v35  ;;  %s263_s17 = sshll.u32 %s409_s16, 4  ;;  %s264_s17 = int_to_ptr.vmem [resolvable:$true] %s263_s17 }
  0x11   :  { %vm158_vm0 = vcmp.lt.s32.totalorder %v155_v1, 1  ;;  %v144_v10 = vadd.f32 1.0, %v143_v6  ;;  %v206_v12 = vperm.slane %v204_v8, 0  ;;  %v207_v13 = vperm.slane %v204_v8, 1 }
  0x12   :  { %v190_v9 = vsel %vm158_vm0, %v189_v5, 0.0  ;;  %v208_v14 = vperm.slane %v204_v8, 2  ;;  %v209_v16 = vperm.slane %v204_v8, 3  ;;  %v174_v40 = vsel %vm158_vm0, %v173_v38, 0.0 }
  0x13   :  { %v191_v11 = vsel %vm175_vm1, %v190_v9, 0.0  ;;  %v146_v15 = vand.u32 2147483647, %v144_v10  ;;  %v214_v17 = vsel %vm158_vm0, %v206_v12, 0.0  ;;  %v215_v18 = vsel %vm158_vm0, %v207_v13, 0.0 }
  0x14   :  { %192 = vadd.xlane.f32.xlu1 %v191_v11  ;;  %v216_v19 = vsel %vm158_vm0, %v208_v14, 0.0  ;;  %v217_v21 = vsel %vm158_vm0, %v209_v16, 0.0  ;;  %v218_v22 = vsel %vm175_vm1, %v214_v17, 0.0  ;;  %v219_v23 = vsel %vm175_vm1, %v215_v18, 0.0 }
  0x15   :  { %v147_v20 = vsub.f32 0.0, %v146_v15  ;;  %v220_v24 = vadd.f32 %v219_v23, %v218_v22  ;;  %v221_v25 = vsel %vm175_vm1, %v216_v19, 0.0  ;;  %v223_v27 = vsel %vm175_vm1, %v217_v21, 0.0 }
  0x16   :  { %v145_v32 = vmax.f32 %v144_v10, 0.0  ;;  %v176_v41 = vsel %vm175_vm1, %v174_v40, 0.0  ;;  %vm251_vm3 = vcmp.eq.s32.totalorder %v248_v7, 1  ;;  %vm249_vm4 = vcmp.eq.s32.totalorder %v248_v7, 0 }
  0x17   :  { %v148_v26 = vmul.f32 1.442695, %v147_v20  ;;  %v222_v28 = vadd.f32 %v221_v25, %v220_v24 }
  0x19   :  { %300 = vpow2.f32 %v148_v26  ;;  %v224_v29 = vadd.f32 %v223_v27, %v222_v28 }
  0x1c   :  { %225 = vadd.xlane.f32.xlu1 %v224_v29 }
  0x1f   :  { %v301_v30 = vpop.eup %300 }
  0x20   :  { %v150_v31 = vadd.f32 1.0, %v301_v30 }
  0x22   :  { %302 = vlog2.f32 %v150_v31 }
  0x28   :  { %v303_v33 = vpop.eup %302 }
  0x29   :  { %v152_v34 = vmul.f32 0.6931472, %v303_v33 }
  0x2b   :  { %v153_v36 = vadd.f32 %v152_v34, %v145_v32 }
  0x2d   :  { %v159_v37 = vsel %vm158_vm0, %v153_v36, 0.0 }
  0x2e   :  { %v161_v39 = vsel %vm160_vm2, %v159_v37, 0.0 }
  0x2f   :  { %162 = vadd.xlane.f32.xlu0 %v161_v39 }
  0x37   :  { %177 = vadd.xlane.f32.xlu0 %v176_v41 }
  0x87   :  { %v193_v42 = vpop.xlane.xlu1 %192 }
  0x88   :  { %v194_v44 = vrot.slane %v193_v42, 4 }
  0x8a   :  { %v195_v49 = vadd.f32 %v194_v44, %v193_v42 }
  0x8c   :  { %v196_v53 = vrot.slane %v195_v49, 2 }
  0x8e   :  { %v197_v60 = vadd.f32 %v196_v53, %v195_v49 }
  0x8f   :  { %v226_v43 = vpop.xlane.xlu1 %225 }
  0x90   :  { %v227_v47 = vrot.slane %v226_v43, 4  ;;  %v198_v1 = vrot.slane %v197_v60, 1 }
  0x92   :  { %v228_v51 = vadd.f32 %v227_v47, %v226_v43  ;;  %v199_v5 = vadd.f32 %v198_v1, %v197_v60 }
  0x94   :  { %v229_v55 = vrot.slane %v228_v51, 2 }
  0x96   :  { %v230_v61 = vadd.f32 %v229_v55, %v228_v51 }
  0x98   :  { %v231_v3 = vrot.slane %v230_v61, 1 }
  0x9a   :  { %v232_v6 = vadd.f32 %v231_v3, %v230_v61 }
  0xa2   :  { %v163_v45 = vpop.xlane.xlu0 %162 }
  0xa3   :  { %v164_v46 = vrot.slane %v163_v45, 4 }
  0xa5   :  { %v165_v48 = vadd.f32 %v164_v46, %v163_v45 }
  0xa7   :  { %v166_v50 = vrot.slane %v165_v48, 2 }
  0xa9   :  { %v167_v52 = vadd.f32 %v166_v50, %v165_v48 }
  0xaa   :  { %v178_v54 = vpop.xlane.xlu0 %177 }
  0xab   :  { %v179_v56 = vrot.slane %v178_v54, 4  ;;  %v168_v57 = vrot.slane %v167_v52, 1 }
  0xad   :  { %v180_v58 = vadd.f32 %v179_v56, %v178_v54  ;;  %v169_v59 = vadd.f32 %v168_v57, %v167_v52 }
  0xaf   :  { %v181_v62 = vrot.slane %v180_v58, 2  ;;  %288 = vpush %v169_v59 }
  0xb1   :  { %v182_v63 = vadd.f32 %v181_v62, %v180_v58 }
  0xb3   :  { %v183_v2 = vrot.slane %v182_v63, 1 }
  0xb5   :  { %v184_v4 = vadd.f32 %v183_v2, %v182_v63 }
  0xb7   :  { %290 = vpush %v184_v4 }
  0xb8   :  { %292 = vpush %v199_v5 }
  0xb9   :  { %294 = vpush %v232_v6 }
  0xe0   :  { %s289_s2 = spop %288 }
  0xe1   :  { %s171_s15 = smul.f32 0.03125, %s289_s2 }
  0xe3   :  { %v255_v9 = vstv %s171_s15 }
  0xe8   :  { %s291_s8 = spop %290 }
  0xe9   :  { %s186_s9 = smul.f32 0.00125, %s291_s8  ;;  %s293_s10 = spop %292 }
  0xea   :  { %s201_s11 = smul.f32 0.00125, %s293_s10  ;;  %s295_s12 = spop %294 }
  0xeb   :  { %s234_s14 = smul.f32 0.0003125, %s295_s12 }
  0xec   :  { %s202_s13 = sadd.f32 %s201_s11, %s186_s9 }
  0xee   :  { %s235_s18 = sadd.f32 %s234_s14, %s202_s13 }
  0xf0   :  { %v253_v8 = vstv %s235_s18 }
  0xf1   :  { %v254_v10 = vsel %vm251_vm3, %v253_v8, 0.0 }
  0xf2   :  { %v256_v11 = vsel %vm249_vm4, %v255_v9, %v254_v10 }
  0xf3   :  { %257 = vst [vmem:[#allocation9] sm:$0xff] %v256_v11 }
  0xf4   :  { %268 = dma.vmem_to_hbm [thread:$0]  %s264_s17, 128, %s266_s21, [#allocation5]  }
  0xf5   :  { %404 = dma.done.wait [#allocation5], 128  }
  0xf6   :  { %405 = vsyncadd [#allocation5], 4294967168 }
  0xf7   :  { %273 = vsyncpa [#allocation4], 1 }
  0xf8   :  { %274 = vsyncpa [#allocation7], 1 }
  0xf9   :  { %275 = vsyncpa [#allocation5], 1 }

</bundles_post_ra>
